<compile_context>
chip_gen: v7x
topology: tpu7x:2x2x1
jax: 0.10.0
libtpu: 0.0.40
codegen_flags: <defaults>
</compile_context>

<pallas_src>
import functools

import jax
import jax.numpy as jnp
import numpy as np
from jax.experimental import pallas as pl
from jax.experimental.pallas import tpu as pltpu

WT = 0.6            # transform_w
WM = 0.4            # match_w
HUBER_DELTA = 1.0   # torch.nn.HuberLoss default
LANE = 128
SUBLANE = 8
ROW_QUANTUM = 16    # sublane-row quantum for the batch tile (works for f32 & bf16)


def _round_up(x, m):
    return ((x + m - 1) // m) * m


def _stable_bce_with_logits(x, y):
    # Numerically stable BCE-with-logits: max(x, 0) - x*y + log1p(exp(-|x|)).
    return jnp.maximum(x, 0.0) - x * y + jnp.log1p(jnp.exp(-jnp.abs(x)))


def _finalize(bce_sum, rot_sum, tr_sum, cnt, *, n_match_elems, n_rot, n_trans):
    """Shared finalization: means, -1 sentinels, loss weighting (a few scalar ops)."""
    bce_mean = bce_sum / n_match_elems
    has_match = cnt > 0.0
    rot_mean = rot_sum / jnp.maximum(cnt * float(n_rot), 1.0)
    tr_mean = tr_sum / jnp.maximum(cnt * float(n_trans), 1.0)
    rotation_loss = jnp.where(has_match, rot_mean, -1.0)
    translation_loss = jnp.where(has_match, tr_mean, -1.0)
    transform_loss = jnp.where(has_match, rot_mean + tr_mean, 0.0)
    combined = WT * transform_loss + WM * bce_mean
    loss_info = {
        "match_loss": bce_mean,
        "rotation_loss": rotation_loss,
        "translation_loss": translation_loss,
        "transform_loss": transform_loss,
        "combined_loss": combined,
    }
    return combined, loss_info


def _combined_loss_kernel(pred_ref, gt_ref, out_ref, acc_ref, *, n_match, n_rot):
    i = pl.program_id(1)   # step within this batch slice (reduction axis)

    @pl.when(i == 0)
    def _init():
        acc_ref[...] = jnp.zeros_like(acc_ref)

    # Inputs arrive at their HBM precision (f32 or bf16); all math in f32.
    pred = pred_ref[...].astype(jnp.float32)   # (F, rows, 128) dense planes
    gt = gt_ref[...].astype(jnp.float32)

    pm = pred[:n_match]                        # match logits     (K,   rows, 128)
    gm = gt[:n_match]                          # match targets
    p_rot = pred[n_match:n_match + n_rot]      # rotation         (2,   rows, 128)
    g_rot = gt[n_match:n_match + n_rot]
    p_tr = pred[n_match + n_rot:]              # translation      (D-2, rows, 128)
    g_tr = gt[n_match + n_rot:]

    bce = _stable_bce_with_logits(pm, gm)

    # Row mask from gt_match[:, 0] == 1 (batch lives on the sublane x lane plane).
    match = gm[0] == 1.0                       # (rows, 128) bool

    d_rot = p_rot - g_rot
    ad_rot = jnp.abs(d_rot)
    huber = jnp.where(ad_rot < HUBER_DELTA,
                      0.5 * d_rot * d_rot,
                      HUBER_DELTA * (ad_rot - 0.5 * HUBER_DELTA))
    l1 = jnp.abs(p_tr - g_tr)

    # One fused contribution tile -> a single full-vreg RMW into the accumulator.
    contrib = jnp.concatenate(
        [bce,
         jnp.where(match[None], huber, 0.0),
         jnp.where(match[None], l1, 0.0),
         match.astype(jnp.float32)[None]],
        axis=0)                                # (F + 1, rows, 128)
    acc_ref[...] += contrib

    # Each batch slice emits its partial sums on its final step (canonical
    # accumulator-writeback idiom); finalization happens in the wrapper.
    @pl.when(i == pl.num_programs(1) - 1)
    def _emit_partials():
        acc = acc_ref[...]
        bce_s = jnp.sum(jnp.sum(acc[:n_match], axis=0))
        rot_s = jnp.sum(jnp.sum(acc[n_match:n_match + n_rot], axis=0))
        tr_s = jnp.sum(jnp.sum(acc[n_match + n_rot:-1], axis=0))
        cnt_s = jnp.sum(acc[-1])
        sub = jax.lax.broadcasted_iota(jnp.int32, (SUBLANE, LANE), 0)
        blk = jnp.where(sub == 0, bce_s,
              jnp.where(sub == 1, rot_s,
              jnp.where(sub == 2, tr_s,
              jnp.where(sub == 3, cnt_s, 0.0))))
        out_ref[0] = blk


def combined_loss_jnp(pred, gt):
    """Small-batch fast path: plain fused-XLA elementwise + reduce."""
    pred_match, pred_tf = pred
    gt_match, gt_tf = gt
    f32 = jnp.float32
    pm, gm = pred_match.astype(f32), gt_match.astype(f32)
    pt, gtt = pred_tf.astype(f32), gt_tf.astype(f32)
    B, K = pm.shape
    D = pt.shape[1]
    n_rot, n_trans = 2, D - 2

    bce_sum = jnp.sum(_stable_bce_with_logits(pm, gm))
    mask = (gm[:, 0] == 1.0).astype(f32)[:, None]
    cnt = jnp.sum(mask)
    d_rot = pt[:, :n_rot] - gtt[:, :n_rot]
    ad = jnp.abs(d_rot)
    huber = jnp.where(ad < HUBER_DELTA, 0.5 * d_rot * d_rot,
                      HUBER_DELTA * (ad - 0.5 * HUBER_DELTA))
    rot_sum = jnp.sum(huber * mask)
    tr_sum = jnp.sum(jnp.abs(pt[:, n_rot:] - gtt[:, n_rot:]) * mask)
    return _finalize(bce_sum, rot_sum, tr_sum, cnt,
                     n_match_elems=float(B * K), n_rot=n_rot, n_trans=n_trans)


def combined_loss(pred, gt, *, batch_tile=32768, min_pallas_batch=1024,
                  interpret=False):
    """Pallas equivalent of CombinedLoss.forward(pred, gt).

    pred = (pred_match (B,K), pred_transform (B,D))
    gt   = (gt_match   (B,K), gt_transform   (B,D))
    Returns (combined_loss_scalar, loss_info dict of scalars).
    """
    pred_match, pred_tf = pred
    gt_match, gt_tf = gt

    B, K = pred_match.shape
    _, D = pred_tf.shape
    assert pred_tf.shape[0] == B and gt_match.shape == (B, K) and gt_tf.shape == (B, D)
    assert D > 2, "transform must have 2 rotation + >=1 translation columns"
    n_rot, n_trans = 2, D - 2
    F = K + D

    # Small-batch fast path: relayout + kernel launch would dominate.
    if B < min_pallas_batch:
        return combined_loss_jnp(pred, gt)

    # Carry bf16 inputs at bf16 through HBM/DMA (halves traffic); f32 otherwise.
    in_dt = jnp.promote_types(jnp.promote_types(pred_match.dtype, pred_tf.dtype),
                              jnp.promote_types(gt_match.dtype, gt_tf.dtype))
    work_dt = jnp.bfloat16 if in_dt == jnp.dtype(jnp.bfloat16) else jnp.float32

    # --- Tiling: batch on both vreg axes -> dense (rows_tile, 128) planes. ---
    rows_needed = -(-B // LANE)
    rows_tile = min(max(batch_tile // LANE, ROW_QUANTUM), max(rows_needed, ROW_QUANTUM))
    rows_tile = _round_up(rows_tile, ROW_QUANTUM)
    tb = rows_tile * LANE                        # batch lanes per grid step
    steps_total = -(-B // tb)
    num_slices = 2 if steps_total >= 2 else 1    # feeds both TensorCores on v7x
    steps_per_slice = -(-steps_total // num_slices)
    B_pad = num_slices * steps_per_slice * tb

    # Padded rows are neutral: pred_match -> -1e30 gives exactly-zero stable BCE;
    # gt_match -> 0 never matches, so Huber/L1 sums and the match count are exact.
    def _prep(match_arr, tf_arr, match_pad):
        pad = B_pad - B
        m = match_arr.astype(work_dt)
        t = tf_arr.astype(work_dt)
        if pad:
            m = jnp.pad(m, ((0, pad), (0, 0)), constant_values=match_pad)
            t = jnp.pad(t, ((0, pad), (0, 0)))
        stacked = jnp.concatenate([m, t], axis=1).T      # (F, B_pad)
        return stacked.reshape(F, B_pad // LANE, LANE)   # free contiguous reshape

    pred_all = _prep(pred_match, pred_tf, -1e30)
    gt_all = _prep(gt_match, gt_tf, 0.0)

    kernel = functools.partial(_combined_loss_kernel, n_match=K, n_rot=n_rot)
    in_map = lambda c, i: (0, c * steps_per_slice + i, 0)

    partials = pl.pallas_call(
        kernel,
        out_shape=jax.ShapeDtypeStruct((num_slices, SUBLANE, LANE), jnp.float32),
        grid_spec=pltpu.PrefetchScalarGridSpec(
            num_scalar_prefetch=0,
            grid=(num_slices, steps_per_slice),
            in_specs=[
                pl.BlockSpec((F, rows_tile, LANE), in_map),
                pl.BlockSpec((F, rows_tile, LANE), in_map),
            ],
            out_specs=pl.BlockSpec((1, SUBLANE, LANE), lambda c, i: (c, 0, 0)),
            scratch_shapes=[pltpu.VMEM((F + 1, rows_tile, LANE), jnp.float32)],
        ),
        compiler_params=pltpu.CompilerParams(
            dimension_semantics=("parallel", "arbitrary"),
            vmem_limit_bytes=32 * 1024 * 1024,   # safe on v7x (64 MiB physical) too
        ),
        interpret=interpret,
    )(pred_all, gt_all)

    # Combine per-slice partial sums and finalize (tiny scalar work).
    sums = jnp.sum(partials[:, :4, 0], axis=0)
    return _finalize(sums[0], sums[1], sums[2], sums[3],
                     n_match_elems=float(B * K), n_rot=n_rot, n_trans=n_trans)


def _reference(pred, gt):
    """Pure-numpy reference mirroring the PyTorch forward."""
    def to_np(x):
        return np.asarray(jnp.asarray(x, jnp.float32))
    pred_match, pred_tf = (to_np(x) for x in pred)
    gt_match, gt_tf = (to_np(x) for x in gt)
    x, y = pred_match, gt_match
    bce = np.maximum(x, 0.0) - x * y + np.log1p(np.exp(-np.abs(x)))
    bce_mean = bce.mean()
    idx = [i for i, v in enumerate(gt_match[:, 0].tolist()) if v == 1.0]
    if idx:
        pr, gr = pred_tf[idx, :2], gt_tf[idx, :2]
        d = pr - gr
        ad = np.abs(d)
        huber = np.where(ad < HUBER_DELTA, 0.5 * d * d,
                         HUBER_DELTA * (ad - 0.5 * HUBER_DELTA))
        rot = huber.mean()
        trans = np.abs(pred_tf[idx, 2:] - gt_tf[idx, 2:]).mean()
        tform = rot + trans
    else:
        rot, trans, tform = -1.0, -1.0, 0.0
    out = WT * tform + WM * bce_mean
    return np.array([out, bce_mean, rot, trans, tform], np.float32)


def _run_case(name, pred, gt, **kwargs):
    combined, info = combined_loss(pred, gt, **kwargs)
    combined = jax.block_until_ready(combined)
    got = np.array([
        float(combined),
        float(info["match_loss"]),
        float(info["rotation_loss"]),
        float(info["translation_loss"]),
        float(info["transform_loss"]),
    ], np.float32)
    want = _reference(pred, gt)
    np.testing.assert_allclose(got, want, rtol=1e-4, atol=1e-5, err_msg=name)


if __name__ == "__main__":
    k1, k2, k3, k4, k5, k6, k7, k8 = jax.random.split(jax.random.PRNGKey(0), 8)

    # Case 1: small shapes from the module spec (B=8, K=1, D=4), Pallas path forced.
    B, K, D = 8, 1, 4
    pred_match = jax.random.normal(k1, (B, K), jnp.float32) * 2.0
    gt_match = jnp.array([[1.0], [0.0], [1.0], [1.0], [0.0], [0.0], [1.0], [0.0]],
                         jnp.float32)
    pred_tf = jax.random.normal(k3, (B, D), jnp.float32)
    gt_tf = jax.random.normal(k4, (B, D), jnp.float32)
    _run_case("small_pallas", (pred_match, pred_tf), (gt_match, gt_tf),
              min_pallas_batch=0)

    # Case 2: same inputs through the small-batch jnp fast path.
    _run_case("small_jnp", (pred_match, pred_tf), (gt_match, gt_tf))

    # Case 3: no matched rows -> (-1, -1, 0) sentinel branch, Pallas path.
    _run_case("no_match", (pred_match, pred_tf), (jnp.zeros_like(gt_match), gt_tf),
              min_pallas_batch=0)

    # Case 4: multi-step grid, both batch slices, remainder padding, K>1, D>4.
    B, K, D = 6500, 2, 5
    pred_match = jax.random.normal(k5, (B, K), jnp.float32) * 2.0
    gt_match = jax.random.bernoulli(k6, 0.5, (B, K)).astype(jnp.float32)
    pred_tf = jax.random.normal(k7, (B, D), jnp.float32)
    gt_tf = jax.random.normal(k8, (B, D), jnp.float32)
    _run_case("multi_step", (pred_match, pred_tf), (gt_match, gt_tf),
              min_pallas_batch=0, batch_tile=2048)

    # Case 5: bf16 inputs carried at bf16 through HBM/DMA, upcast in-kernel.
    _run_case("bf16",
              (pred_match.astype(jnp.bfloat16), pred_tf.astype(jnp.bfloat16)),
              (gt_match.astype(jnp.bfloat16), gt_tf.astype(jnp.bfloat16)),
              min_pallas_batch=0)

    print("KERNEL_OK")
</pallas_src>

<mosaic_0001>
module attributes {stable_mosaic.version = 11 : i64} {
  func.func @_combined_loss_kernel(%arg0: i32, %arg1: i32, %arg2: memref<5x16x128xf32, #tpu.memory_space<vmem>>, %arg3: memref<5x16x128xf32, #tpu.memory_space<vmem>>, %arg4: memref<1x8x128xf32, #tpu.memory_space<vmem>>, %arg5: memref<6x16x128xf32, #tpu.memory_space<vmem>>) attributes {dimension_semantics = [#tpu.dimension_semantics<parallel>, #tpu.dimension_semantics<arbitrary>], iteration_bounds = array<i64: 1, 1>, scalar_prefetch = 0 : i64, scratch_operands = 1 : i64, tpu.core_type = #tpu.core_type<tc>, window_params = [{transform_indices = @transform_0, window_bounds = array<i64: 5, 16, 128>}, {transform_indices = @transform_1, window_bounds = array<i64: 5, 16, 128>}, {transform_indices = @transform_2, window_bounds = array<i64: 1, 8, 128>}]} {
    %c0_i32 = arith.constant 0 : i32
    %0 = arith.cmpi eq, %arg1, %c0_i32 : i32
    %1 = arith.extui %0 : i1 to i32
    %c0_i32_0 = arith.constant 0 : i32
    %2 = arith.cmpi ne, %1, %c0_i32_0 : i32
    scf.if %2 {
      %cst_22 = arith.constant 0.000000e+00 : f32
      %58 = vector.broadcast %cst_22 : f32 to vector<6x16x128xf32>
      %c0_23 = arith.constant 0 : index
      %c0_24 = arith.constant 0 : index
      %c0_25 = arith.constant 0 : index
      %59 = vector.load %arg5[%c0_23, %c0_24, %c0_25] : memref<6x16x128xf32, #tpu.memory_space<vmem>>, vector<6x16x128xf32>
      tpu.vector_store %arg5[%c0_23, %c0_24, %c0_25], %58 {strides = array<i32>} : memref<6x16x128xf32, #tpu.memory_space<vmem>>, vector<6x16x128xf32>,
    } else {
    }
    %c0 = arith.constant 0 : index
    %c0_1 = arith.constant 0 : index
    %c0_2 = arith.constant 0 : index
    %3 = vector.load %arg2[%c0, %c0_1, %c0_2] : memref<5x16x128xf32, #tpu.memory_space<vmem>>, vector<5x16x128xf32>
    %c0_3 = arith.constant 0 : index
    %c0_4 = arith.constant 0 : index
    %c0_5 = arith.constant 0 : index
    %4 = vector.load %arg3[%c0_3, %c0_4, %c0_5] : memref<5x16x128xf32, #tpu.memory_space<vmem>>, vector<5x16x128xf32>
    %5 = vector.extract_strided_slice %3 {offsets = [0, 0, 0], sizes = [1, 16, 128], strides = [1, 1, 1]} : vector<5x16x128xf32> to vector<1x16x128xf32>
    %6 = vector.extract_strided_slice %4 {offsets = [0, 0, 0], sizes = [1, 16, 128], strides = [1, 1, 1]} : vector<5x16x128xf32> to vector<1x16x128xf32>
    %7 = vector.extract_strided_slice %3 {offsets = [1, 0, 0], sizes = [2, 16, 128], strides = [1, 1, 1]} : vector<5x16x128xf32> to vector<2x16x128xf32>
    %8 = vector.extract_strided_slice %4 {offsets = [1, 0, 0], sizes = [2, 16, 128], strides = [1, 1, 1]} : vector<5x16x128xf32> to vector<2x16x128xf32>
    %9 = vector.extract_strided_slice %3 {offsets = [3, 0, 0], sizes = [2, 16, 128], strides = [1, 1, 1]} : vector<5x16x128xf32> to vector<2x16x128xf32>
    %10 = vector.extract_strided_slice %4 {offsets = [3, 0, 0], sizes = [2, 16, 128], strides = [1, 1, 1]} : vector<5x16x128xf32> to vector<2x16x128xf32>
    %cst = arith.constant 0.000000e+00 : f32
    %11 = vector.broadcast %cst : f32 to vector<1x16x128xf32>
    %12 = arith.maximumf %5, %11 : vector<1x16x128xf32>
    %13 = arith.mulf %5, %6 : vector<1x16x128xf32>
    %14 = arith.subf %12, %13 : vector<1x16x128xf32>
    %15 = math.absf %5 : vector<1x16x128xf32>
    %cst_6 = arith.constant 0.000000e+00 : f32
    %16 = vector.broadcast %cst_6 : f32 to vector<1x16x128xf32>
    %17 = arith.subf %16, %15 : vector<1x16x128xf32>
    %18 = math.exp %17 : vector<1x16x128xf32>
    %19 = math.log1p %18 : vector<1x16x128xf32>
    %20 = arith.addf %14, %19 : vector<1x16x128xf32>
    %21 = vector.shape_cast %6 : vector<1x16x128xf32> to vector<16x128xf32>
    %cst_7 = arith.constant 1.000000e+00 : f32
    %22 = vector.broadcast %cst_7 : f32 to vector<16x128xf32>
    %23 = arith.cmpf oeq, %21, %22 : vector<16x128xf32>
    %24 = arith.subf %7, %8 : vector<2x16x128xf32>
    %25 = math.absf %24 : vector<2x16x128xf32>
    %cst_8 = arith.constant 1.000000e+00 : f32
    %26 = vector.broadcast %cst_8 : f32 to vector<2x16x128xf32>
    %27 = arith.cmpf olt, %25, %26 : vector<2x16x128xf32>
    %cst_9 = arith.constant 5.000000e-01 : f32
    %28 = vector.broadcast %cst_9 : f32 to vector<2x16x128xf32>
    %29 = arith.mulf %28, %24 : vector<2x16x128xf32>
    %30 = arith.mulf %29, %24 : vector<2x16x128xf32>
    %cst_10 = arith.constant 5.000000e-01 : f32
    %31 = vector.broadcast %cst_10 : f32 to vector<2x16x128xf32>
    %32 = arith.subf %25, %31 : vector<2x16x128xf32>
    %cst_11 = arith.constant 1.000000e+00 : f32
    %33 = vector.broadcast %cst_11 : f32 to vector<2x16x128xf32>
    %34 = arith.mulf %33, %32 : vector<2x16x128xf32>
    %35 = arith.select %27, %30, %34 : vector<2x16x128xi1>, vector<2x16x128xf32>
    %36 = arith.subf %9, %10 : vector<2x16x128xf32>
    %37 = math.absf %36 : vector<2x16x128xf32>
    %38 = vector.shape_cast %23 : vector<16x128xi1> to vector<1x16x128xi1>
    %cst_12 = arith.constant 0.000000e+00 : f32
    %39 = vector.shape_cast %38 : vector<1x16x128xi1> to vector<1x16x128xi1>
    %40 = vector.broadcast %39 : vector<1x16x128xi1> to vector<2x16x128xi1>
    %41 = vector.broadcast %cst_12 : f32 to vector<2x16x128xf32>
    %42 = arith.select %40, %35, %41 : vector<2x16x128xi1>, vector<2x16x128xf32>
    %43 = vector.shape_cast %23 : vector<16x128xi1> to vector<1x16x128xi1>
    %cst_13 = arith.constant 0.000000e+00 : f32
    %44 = vector.shape_cast %43 : vector<1x16x128xi1> to vector<1x16x128xi1>
    %45 = vector.broadcast %44 : vector<1x16x128xi1> to vector<2x16x128xi1>
    %46 = vector.broadcast %cst_13 : f32 to vector<2x16x128xf32>
    %47 = arith.select %45, %37, %46 : vector<2x16x128xi1>, vector<2x16x128xf32>
    %48 = arith.extui %23 : vector<16x128xi1> to vector<16x128xi32>
    %49 = arith.sitofp %48 : vector<16x128xi32> to vector<16x128xf32>
    %50 = vector.shape_cast %49 : vector<16x128xf32> to vector<1x16x128xf32>
    %51 = tpu.concatenate %20, %42, %47, %50 in 0 : vector<1x16x128xf32>, vector<2x16x128xf32>, vector<2x16x128xf32>, vector<1x16x128xf32> -> vector<6x16x128xf32>
    %c0_14 = arith.constant 0 : index
    %c0_15 = arith.constant 0 : index
    %c0_16 = arith.constant 0 : index
    %52 = vector.load %arg5[%c0_14, %c0_15, %c0_16] : memref<6x16x128xf32, #tpu.memory_space<vmem>>, vector<6x16x128xf32>
    %53 = arith.addf %52, %51 : vector<6x16x128xf32>
    %c0_17 = arith.constant 0 : index
    %c0_18 = arith.constant 0 : index
    %c0_19 = arith.constant 0 : index
    %54 = vector.load %arg5[%c0_17, %c0_18, %c0_19] : memref<6x16x128xf32, #tpu.memory_space<vmem>>, vector<6x16x128xf32>
    tpu.vector_store %arg5[%c0_17, %c0_18, %c0_19], %53 {strides = array<i32>} : memref<6x16x128xf32, #tpu.memory_space<vmem>>, vector<6x16x128xf32>,
    %c0_i32_20 = arith.constant 0 : i32
    %55 = arith.cmpi eq, %arg1, %c0_i32_20 : i32
    %56 = arith.extui %55 : i1 to i32
    %c0_i32_21 = arith.constant 0 : i32
    %57 = arith.cmpi ne, %56, %c0_i32_21 : i32
    scf.if %57 {
      %c0_22 = arith.constant 0 : index
      %c0_23 = arith.constant 0 : index
      %c0_24 = arith.constant 0 : index
      %58 = vector.load %arg5[%c0_22, %c0_23, %c0_24] : memref<6x16x128xf32, #tpu.memory_space<vmem>>, vector<6x16x128xf32>
      %59 = vector.extract_strided_slice %58 {offsets = [0, 0, 0], sizes = [1, 16, 128], strides = [1, 1, 1]} : vector<6x16x128xf32> to vector<1x16x128xf32>
      %cst_25 = arith.constant dense<0.000000e+00> : vector<16x128xf32>
      %60 = vector.multi_reduction <add>, %59, %cst_25 [0] : vector<1x16x128xf32> to vector<16x128xf32>
      %61 = vector.shape_cast %60 : vector<16x128xf32> to vector<1x16x128xf32>
      %cst_26 = arith.constant dense<0.000000e+00> : vector<1xf32>
      %62 = vector.multi_reduction <add>, %61, %cst_26 [1, 2] : vector<1x16x128xf32> to vector<1xf32>
      %63 = vector.shape_cast %62 : vector<1xf32> to vector<1x1x1xf32>
      %64 = vector.extract %63[0, 0, 0] : f32 from vector<1x1x1xf32>
      %65 = vector.extract_strided_slice %58 {offsets = [1, 0, 0], sizes = [2, 16, 128], strides = [1, 1, 1]} : vector<6x16x128xf32> to vector<2x16x128xf32>
      %cst_27 = arith.constant dense<0.000000e+00> : vector<16x128xf32>
      %66 = vector.multi_reduction <add>, %65, %cst_27 [0] : vector<2x16x128xf32> to vector<16x128xf32>
      %67 = vector.shape_cast %66 : vector<16x128xf32> to vector<1x16x128xf32>
      %cst_28 = arith.constant dense<0.000000e+00> : vector<1xf32>
      %68 = vector.multi_reduction <add>, %67, %cst_28 [1, 2] : vector<1x16x128xf32> to vector<1xf32>
      %69 = vector.shape_cast %68 : vector<1xf32> to vector<1x1x1xf32>
      %70 = vector.extract %69[0, 0, 0] : f32 from vector<1x1x1xf32>
      %71 = vector.extract_strided_slice %58 {offsets = [3, 0, 0], sizes = [2, 16, 128], strides = [1, 1, 1]} : vector<6x16x128xf32> to vector<2x16x128xf32>
      %cst_29 = arith.constant dense<0.000000e+00> : vector<16x128xf32>
      %72 = vector.multi_reduction <add>, %71, %cst_29 [0] : vector<2x16x128xf32> to vector<16x128xf32>
      %73 = vector.shape_cast %72 : vector<16x128xf32> to vector<1x16x128xf32>
      %cst_30 = arith.constant dense<0.000000e+00> : vector<1xf32>
      %74 = vector.multi_reduction <add>, %73, %cst_30 [1, 2] : vector<1x16x128xf32> to vector<1xf32>
      %75 = vector.shape_cast %74 : vector<1xf32> to vector<1x1x1xf32>
      %76 = vector.extract %75[0, 0, 0] : f32 from vector<1x1x1xf32>
      %77 = vector.extract_strided_slice %58 {offsets = [5, 0, 0], sizes = [1, 16, 128], strides = [1, 1, 1]} : vector<6x16x128xf32> to vector<1x16x128xf32>
      %78 = vector.shape_cast %77 : vector<1x16x128xf32> to vector<16x128xf32>
      %79 = vector.shape_cast %78 : vector<16x128xf32> to vector<1x16x128xf32>
      %cst_31 = arith.constant dense<0.000000e+00> : vector<1xf32>
      %80 = vector.multi_reduction <add>, %79, %cst_31 [1, 2] : vector<1x16x128xf32> to vector<1xf32>
      %81 = vector.shape_cast %80 : vector<1xf32> to vector<1x1x1xf32>
      %82 = vector.extract %81[0, 0, 0] : f32 from vector<1x1x1xf32>
      %83 = tpu.iota {dimensions = array<i32: 0>} : vector<8x128xi32>
      %c0_i32_32 = arith.constant 0 : i32
      %84 = vector.broadcast %c0_i32_32 : i32 to vector<8x128xi32>
      %85 = arith.cmpi eq, %83, %84 : vector<8x128xi32>
      %c1_i32 = arith.constant 1 : i32
      %86 = vector.broadcast %c1_i32 : i32 to vector<8x128xi32>
      %87 = arith.cmpi eq, %83, %86 : vector<8x128xi32>
      %c2_i32 = arith.constant 2 : i32
      %88 = vector.broadcast %c2_i32 : i32 to vector<8x128xi32>
      %89 = arith.cmpi eq, %83, %88 : vector<8x128xi32>
      %c3_i32 = arith.constant 3 : i32
      %90 = vector.broadcast %c3_i32 : i32 to vector<8x128xi32>
      %91 = arith.cmpi eq, %83, %90 : vector<8x128xi32>
      %cst_33 = arith.constant 0.000000e+00 : f32
      %92 = vector.broadcast %82 : f32 to vector<8x128xf32>
      %93 = vector.broadcast %cst_33 : f32 to vector<8x128xf32>
      %94 = arith.select %91, %92, %93 : vector<8x128xi1>, vector<8x128xf32>
      %95 = vector.broadcast %76 : f32 to vector<8x128xf32>
      %96 = arith.select %89, %95, %94 : vector<8x128xi1>, vector<8x128xf32>
      %97 = vector.broadcast %70 : f32 to vector<8x128xf32>
      %98 = arith.select %87, %97, %96 : vector<8x128xi1>, vector<8x128xf32>
      %99 = vector.broadcast %64 : f32 to vector<8x128xf32>
      %100 = arith.select %85, %99, %98 : vector<8x128xi1>, vector<8x128xf32>
      %c0_34 = arith.constant 0 : index
      %c0_35 = arith.constant 0 : index
      %c0_36 = arith.constant 0 : index
      %101 = vector.load %arg4[%c0_34, %c0_35, %c0_36] : memref<1x8x128xf32, #tpu.memory_space<vmem>>, vector<1x8x128xf32>
      %102 = vector.shape_cast %101 : vector<1x8x128xf32> to vector<8x128xf32>
      %103 = vector.shape_cast %100 : vector<8x128xf32> to vector<1x8x128xf32>
      tpu.vector_store %arg4[%c0_34, %c0_35, %c0_36], %103 {strides = array<i32>} : memref<1x8x128xf32, #tpu.memory_space<vmem>>, vector<1x8x128xf32>,
    } else {
    }
    return
  }
  func.func @transform_0(%arg0: i32, %arg1: i32) -> (i32, i32, i32) {
    %c1_i32 = arith.constant 1 : i32
    %0 = arith.muli %arg0, %c1_i32 : i32
    %1 = arith.addi %0, %arg1 : i32
    %c0_i32 = arith.constant 0 : i32
    %c0_i32_0 = arith.constant 0 : i32
    %c0_i32_1 = arith.constant 0 : i32
    return %c0_i32, %1, %c0_i32_0 : i32, i32, i32
  }
  func.func @transform_1(%arg0: i32, %arg1: i32) -> (i32, i32, i32) {
    %c1_i32 = arith.constant 1 : i32
    %0 = arith.muli %arg0, %c1_i32 : i32
    %1 = arith.addi %0, %arg1 : i32
    %c0_i32 = arith.constant 0 : i32
    %c0_i32_0 = arith.constant 0 : i32
    %c0_i32_1 = arith.constant 0 : i32
    return %c0_i32, %1, %c0_i32_0 : i32, i32, i32
  }
  func.func @transform_2(%arg0: i32, %arg1: i32) -> (i32, i32, i32) {
    %c0_i32 = arith.constant 0 : i32
    %c0_i32_0 = arith.constant 0 : i32
    %c0_i32_1 = arith.constant 0 : i32
    return %arg0, %c0_i32, %c0_i32_0 : i32, i32, i32
  }
}

</mosaic_0001>

<bundles_post_ra>
// kernel: tpu_custom_call.1
= control target key start
LH: loop header
LB: loop body
LE: loop exit
PB: predicated region body
PF: predicated region fallthrough
CT: control target
= control target key end

     0   :  { %7 = vsyncpa [#allocation4], 0  ;;  %s521_s0 = inlined_call_operand.hbm [shape: f32[5,16,128], index: 0, kind: input, shape index: {}]   ;;  %s522_s1 = inlined_call_operand.hbm [shape: f32[5,16,128], index: 1, kind: input, shape index: {}]   ;;  %s523_s2 = inlined_call_operand.hbm [shape: f32[1,8,128], index: 2, kind: output, shape index: {}]  }
   0x1   :  { %8 = vsyncpa [#allocation7], 0 }
   0x2   :  { %9 = vsyncpa [#allocation5], 0  ;;  %s402_s9 = smov [#allocation3]   ;;  %s330_s13 = scalar_lea.hbm %s521_s0, 1280 }
   0x3   :  { %s19_s10 = sshll.u32 %s402_s9, 4  ;;  %p331_p0 = scmp.ne.s32.totalorder %s521_s0, %s330_s13  ;;  %s20_s10 = int_to_ptr.vmem [resolvable:$true] %s19_s10 }
   0x4   :  { %p334_p1 = scmp.lt.u32.totalorder %s330_s13, %s521_s0 }
   0x6   :  { %p336_p2 = pnand %p334_p1, %p331_p0 }
   0x8   :  { %339 = shalt.err (!%p336_p2)
}
   0x9   :  { %s340_s18 = scalar_lea.vmem %s20_s10, 1280  ;;  %p345_p4 = scmp.lt.s32.totalorder %s20_s10, %s20_s10 }
   0xa   :  { %p341_p3 = scmp.ne.s32.totalorder %s20_s10, %s340_s18  ;;  %p346_p5 = scmp.lt.s32.totalorder %s340_s18, %s340_s18 }
   0xc   :  { %p347_p6 = por %p346_p5, %p345_p4 }
   0xe   :  { %p348_p7 = pnand %p347_p6, %p341_p3 }
  0x10   :  { %351 = shalt.err (!%p348_p7)
}
  0x11   :  { %s403_s19 = smov 128   ;;  %s404_s20 = smov 8  }
  0x12   :  { %25 = dma.hbm_to_vmem [thread:$0]  %s521_s0, 1280, %s20_s10, [#allocation4], %s403_s19, %s403_s19, %s404_s20  }
  0x13   :  { %s405_s23 = smov [#allocation6]   ;;  %s352_s27 = scalar_lea.hbm %s522_s1, 1280 }
  0x14   :  { %s35_s24 = sshll.u32 %s405_s23, 4  ;;  %p353_p8 = scmp.ne.s32.totalorder %s522_s1, %s352_s27  ;;  %s36_s24 = int_to_ptr.vmem [resolvable:$true] %s35_s24 }
  0x15   :  { %p356_p9 = scmp.lt.u32.totalorder %s352_s27, %s522_s1 }
  0x17   :  { %p358_p10 = pnand %p356_p9, %p353_p8 }
  0x19   :  { %361 = shalt.err (!%p358_p10)
}
  0x1a   :  { %s362_s4 = scalar_lea.vmem %s36_s24, 1280  ;;  %p367_p12 = scmp.lt.s32.totalorder %s36_s24, %s36_s24 }
  0x1b   :  { %p363_p11 = scmp.ne.s32.totalorder %s36_s24, %s362_s4  ;;  %p368_p13 = scmp.lt.s32.totalorder %s362_s4, %s362_s4 }
  0x1d   :  { %p369_p0 = por %p368_p13, %p367_p12 }
  0x1f   :  { %p370_p1 = pnand %p369_p0, %p363_p11 }
  0x21   :  { %373 = shalt.err (!%p370_p1)
}
  0x22   :  { %41 = dma.hbm_to_vmem [thread:$0]  %s522_s1, 1280, %s36_s24, [#allocation7], %s403_s19, %s403_s19, %s404_s20  }
  0x23   :  { %396 = dma.done.wait [#allocation4], 1280  }
  0x24   :  { %397 = vsyncadd [#allocation4], 4294966016 }
  0x25   :  { %398 = dma.done.wait [#allocation7], 1280  }
  0x26   :  { %399 = vsyncadd [#allocation7], 4294966016  ;;  %v74_v0 = vld [vmem:[#allocation3 + $0x30] sm:$0xff]  ;;  %v75_v1 = vld [vmem:[#allocation3 + $0x38] sm:$0xff]  ;;  %v406_v30 = vmov 0.0   ;;  %s407_s9 = smov [#allocation8]  }
  0x27   :  { %v76_v2 = vld [vmem:[#allocation3 + $0x40] sm:$0xff]  ;;  %v77_v3 = vld [vmem:[#allocation3 + $0x48] sm:$0xff]  ;;  %v447_v4 = vld [vmem:[#allocation6] sm:$0xff]  ;;  %s292_s10 = sshll.u32 %s407_s9, 4  ;;  %s293_s10 = int_to_ptr.vmem [resolvable:$true] %s292_s10 }
  0x28   :  { %v449_v5 = vld [vmem:[#allocation6 + $0x8] sm:$0xff]  ;;  %v84_v6 = vld [vmem:[#allocation6 + $0x30] sm:$0xff]  ;;  %v85_v7 = vld [vmem:[#allocation6 + $0x38] sm:$0xff]  ;;  %vm122_vm0 = vcmp.eq.f32.partialorder %v447_v4, 1.0  ;;  %s374_s11 = scalar_lea.vmem %s293_s10, 128  ;;  %p379_p3 = scmp.lt.s32.totalorder %s293_s10, %s293_s10 }
  0x29   :  { %v86_v8 = vld [vmem:[#allocation6 + $0x40] sm:$0xff]  ;;  %v87_v9 = vld [vmem:[#allocation6 + $0x48] sm:$0xff]  ;;  %v152_v10 = vsub.f32 %v74_v0, %v84_v6  ;;  %v153_v11 = vsub.f32 %v75_v1, %v85_v7  ;;  %v451_v13 = vld [vmem:[#allocation3] sm:$0xff]  ;;  %vm123_vm1 = vcmp.eq.f32.partialorder %v449_v5, 1.0  ;;  %v306_v31 = vsel %vm122_vm0, 1.0, %v406_v30  ;;  %p375_p2 = scmp.ne.s32.totalorder %s293_s10, %s374_s11  ;;  %p380_p4 = scmp.lt.s32.totalorder %s374_s11, %s374_s11 }
  0x2a   :  { %v154_v12 = vsub.f32 %v76_v2, %v86_v8  ;;  %v155_v14 = vsub.f32 %v77_v3, %v87_v9  ;;  %v455_v15 = vld [vmem:[#allocation3 + $0x8] sm:$0xff]  ;;  %v94_v20 = vand.u32 2147483647, %v451_v13  ;;  %v307_v32 = vsel %vm123_vm1, 1.0, %v406_v30  ;;  %v70_v37 = vld [vmem:[#allocation3 + $0x10] sm:$0xff]  ;;  %v71_v38 = vld [vmem:[#allocation3 + $0x18] sm:$0xff] }
  0x2b   :  { %v156_v16 = vand.u32 2147483647, %v152_v10  ;;  %v157_v17 = vand.u32 2147483647, %v153_v11  ;;  %v95_v24 = vand.u32 2147483647, %v455_v15  ;;  %v261_v36 = vadd.f32 %v307_v32, %v306_v31  ;;  %p381_p5 = por %p380_p4, %p379_p3 }
  0x2c   :  { %v158_v18 = vand.u32 2147483647, %v154_v12  ;;  %v159_v19 = vand.u32 2147483647, %v155_v14  ;;  %v96_v28 = vsub.f32 0.0, %v94_v20  ;;  %v72_v39 = vld [vmem:[#allocation3 + $0x20] sm:$0xff]  ;;  %v90_v0 = vmul.f32 %v447_v4, %v451_v13 }
  0x2d   :  { %v168_v21 = vsel %vm122_vm0, %v156_v16, 0.0  ;;  %v169_v22 = vsel %vm123_vm1, %v157_v17, 0.0  ;;  %v97_v29 = vsub.f32 0.0, %v95_v24  ;;  %v80_v40 = vld [vmem:[#allocation6 + $0x10] sm:$0xff]  ;;  %v81_v41 = vld [vmem:[#allocation6 + $0x18] sm:$0xff]  ;;  %v82_v43 = vld [vmem:[#allocation6 + $0x20] sm:$0xff]  ;;  %v91_v20 = vmul.f32 %v449_v5, %v455_v15  ;;  %p382_p6 = pnand %p381_p5, %p375_p2 }
  0x2e   :  { %v170_v23 = vsel %vm122_vm0, %v158_v18, 0.0  ;;  %v171_v25 = vsel %vm123_vm1, %v159_v19, 0.0  ;;  %v98_v34 = vmul.f32 1.442695, %v96_v28  ;;  %v73_v42 = vld [vmem:[#allocation3 + $0x28] sm:$0xff]  ;;  %v83_v44 = vld [vmem:[#allocation6 + $0x28] sm:$0xff]  ;;  %v124_v45 = vsub.f32 %v70_v37, %v80_v40 }
  0x2f   :  { %v249_v26 = vadd.f32 %v170_v23, %v168_v21  ;;  %v250_v27 = vadd.f32 %v171_v25, %v169_v22  ;;  %v100_v35 = vmul.f32 1.442695, %v97_v29  ;;  %v125_v46 = vsub.f32 %v71_v38, %v81_v41 }
  0x30   :  { %322 = vpow2.f32 %v98_v34  ;;  %v126_v47 = vsub.f32 %v72_v39, %v82_v43  ;;  %v127_v48 = vsub.f32 %v73_v42, %v83_v44  ;;  %v128_v53 = vand.u32 2147483647, %v124_v45 }
  0x31   :  { %v251_v33 = vadd.f32 %v250_v27, %v249_v26  ;;  %324 = vpow2.f32 %v100_v35  ;;  %v129_v54 = vand.u32 2147483647, %v125_v46  ;;  %v136_v55 = vmul.f32 0.5, %v124_v45 }
  0x32   :  { %v130_v56 = vand.u32 2147483647, %v126_v47  ;;  %v131_v57 = vand.u32 2147483647, %v127_v48  ;;  %v137_v58 = vmul.f32 0.5, %v125_v46  ;;  %v138_v60 = vmul.f32 0.5, %v126_v47 }
  0x33   :  { %252 = vadd.xlane.f32.xlu1 %v251_v33  ;;  %v139_v61 = vmul.f32 0.5, %v127_v48  ;;  %v88_v62 = vmax.f32 %v451_v13, 0.0  ;;  %vm474_vm2 = vcmp.lt.f32.partialorder %v128_v53, 1.0  ;;  %vm478_vm3 = vcmp.lt.f32.partialorder %v129_v54, 1.0 }
  0x34   :  { %v140_v3 = vmul.f32 %v136_v55, %v124_v45  ;;  %v141_v6 = vmul.f32 %v137_v58, %v125_v46  ;;  %v302_v7 = vadd.f32 -0.5, %v128_v53  ;;  %v303_v8 = vadd.f32 -0.5, %v129_v54 }
  0x35   :  { %v304_v9 = vadd.f32 -0.5, %v130_v56  ;;  %v142_v11 = vmul.f32 %v138_v60, %v126_v47  ;;  %v143_v12 = vmul.f32 %v139_v61, %v127_v48  ;;  %v305_v14 = vadd.f32 -0.5, %v131_v57 }
  0x36   :  { %vm482_vm4 = vcmp.lt.f32.partialorder %v130_v56, 1.0  ;;  %vm486_vm5 = vcmp.lt.f32.partialorder %v131_v57, 1.0  ;;  %v89_v19 = vmax.f32 %v455_v15, 0.0  ;;  %v148_v22 = vsel %vm474_vm2, %v140_v3, %v302_v7 }
  0x37   :  { %262 = vadd.xlane.f32.xlu1 %v261_v36  ;;  %v149_v24 = vsel %vm478_vm3, %v141_v6, %v303_v8  ;;  %v150_v25 = vsel %vm482_vm4, %v142_v11, %v304_v9  ;;  %v151_v26 = vsel %vm486_vm5, %v143_v12, %v305_v14  ;;  %v92_v28 = vsub.f32 %v88_v62, %v90_v0 }
  0x38   :  { %v93_v15 = vsub.f32 %v89_v19, %v91_v20  ;;  %v164_v32 = vsel %vm122_vm0, %v148_v22, 0.0  ;;  %v165_v34 = vsel %vm123_vm1, %v149_v24, 0.0  ;;  %v166_v35 = vsel %vm122_vm0, %v150_v25, 0.0 }
  0x39   :  { %v167_v36 = vsel %vm123_vm1, %v151_v26, 0.0  ;;  %v237_v41 = vadd.f32 %v166_v35, %v164_v32  ;;  %v271_v9 = vlaneseq }
  0x3a   :  { %v323_v49 = vpop.eup %322  ;;  %v238_v42 = vadd.f32 %v167_v36, %v165_v34 }
  0x3b   :  { %v325_v50 = vpop.eup %324  ;;  %v102_v51 = vadd.f32 1.0, %v323_v49  ;;  %v105_v59 = vmul.f32 -0.5, %v323_v49  ;;  %v108_v16 = vand.u32 2147483647, %v323_v49 }
  0x3c   :  { %v111_v52 = vadd.f32 1.0, %v325_v50  ;;  %v114_v63 = vmul.f32 -0.5, %v325_v50  ;;  %v117_v21 = vand.u32 2147483647, %v325_v50  ;;  %v239_v44 = vadd.f32 %v238_v42, %v237_v41 }
  0x3d   :  { %326 = vlog2.f32 %v102_v51  ;;  %v106_v10 = vadd.f32 1.0, %v105_v59  ;;  %vm109_vm6 = vcmp.lt.f32.partialorder %v108_v16, 0.0004427343 }
  0x3e   :  { %328 = vlog2.f32 %v111_v52  ;;  %v115_v17 = vadd.f32 1.0, %v114_v63  ;;  %vm118_vm7 = vcmp.lt.f32.partialorder %v117_v21, 0.0004427343 }
  0x3f   :  { %v107_v23 = vmul.f32 %v323_v49, %v106_v10  ;;  %v272_v10 = vshrl.u32 %v271_v9, 7 }
  0x40   :  { %v116_v29 = vmul.f32 %v325_v50, %v115_v17 }
  0x41   :  { %vm276_vm8 = vcmp.eq.s32.totalorder %v272_v10, 3  ;;  %vm275_vm9 = vcmp.eq.s32.totalorder %v272_v10, 2  ;;  %vm274_vm10 = vcmp.eq.s32.totalorder %v272_v10, 1  ;;  %vm273_vm11 = vcmp.eq.s32.totalorder %v272_v10, 0 }
  0x47   :  { %v327_v27 = vpop.eup %326 }
  0x48   :  { %v329_v30 = vpop.eup %328  ;;  %v104_v31 = vmul.f32 0.6931472, %v327_v27 }
  0x49   :  { %v113_v33 = vmul.f32 0.6931472, %v329_v30 }
  0x4a   :  { %v110_v37 = vsel %vm109_vm6, %v107_v23, %v104_v31 }
  0x4b   :  { %v119_v38 = vsel %vm118_vm7, %v116_v29, %v113_v33  ;;  %v120_v39 = vadd.f32 %v110_v37, %v92_v28 }
  0x4c   :  { %v121_v40 = vadd.f32 %v119_v38, %v93_v15 }
  0x4e   :  { %v227_v43 = vadd.f32 %v121_v40, %v120_v39 }
  0x50   :  { %228 = vadd.xlane.f32.xlu0 %v227_v43 }
  0x54   :  { %240 = vadd.xlane.f32.xlu0 %v239_v44 }
  0xc0   :  { %v253_v45 = vpop.xlane.xlu1 %252 }
  0xc1   :  { %v254_v47 = vrot.slane %v253_v45, 4 }
  0xc3   :  { %v255_v49 = vadd.f32 %v254_v47, %v253_v45 }
  0xc4   :  { %v263_v46 = vpop.xlane.xlu1 %262 }
  0xc5   :  { %v264_v48 = vrot.slane %v263_v46, 4  ;;  %v256_v52 = vrot.slane %v255_v49, 2 }
  0xc7   :  { %v265_v50 = vadd.f32 %v264_v48, %v263_v46  ;;  %v257_v59 = vadd.f32 %v256_v52, %v255_v49 }
  0xc9   :  { %v266_v54 = vrot.slane %v265_v50, 2  ;;  %v258_v1 = vrot.slane %v257_v59, 1 }
  0xcb   :  { %v267_v60 = vadd.f32 %v266_v54, %v265_v50  ;;  %v259_v7 = vadd.f32 %v258_v1, %v257_v59 }
  0xcd   :  { %v268_v3 = vrot.slane %v267_v60, 1 }
  0xcf   :  { %v269_v8 = vadd.f32 %v268_v3, %v267_v60 }
  0xdd   :  { %v229_v4 = vpop.xlane.xlu0 %228 }
  0xde   :  { %v230_v51 = vrot.slane %v229_v4, 4 }
  0xe0   :  { %v231_v5 = vadd.f32 %v230_v51, %v229_v4 }
  0xe1   :  { %v241_v53 = vpop.xlane.xlu0 %240 }
  0xe2   :  { %v232_v55 = vrot.slane %v231_v5, 2  ;;  %v242_v56 = vrot.slane %v241_v53, 4 }
  0xe4   :  { %v243_v57 = vadd.f32 %v242_v56, %v241_v53  ;;  %v233_v58 = vadd.f32 %v232_v55, %v231_v5 }
  0xe6   :  { %v244_v61 = vrot.slane %v243_v57, 2  ;;  %v234_v62 = vrot.slane %v233_v58, 1 }
  0xe8   :  { %v245_v63 = vadd.f32 %v244_v61, %v243_v57  ;;  %v235_v0 = vadd.f32 %v234_v62, %v233_v58 }
  0xea   :  { %308 = vpush %v235_v0  ;;  %v246_v2 = vrot.slane %v245_v63, 1 }
  0xec   :  { %v247_v6 = vadd.f32 %v246_v2, %v245_v63 }
  0xee   :  { %310 = vpush %v247_v6 }
  0xef   :  { %312 = vpush %v259_v7 }
  0xf0   :  { %314 = vpush %v269_v8 }
 0x11b   :  { %s309_s1 = spop %308 }
 0x11c   :  { %v283_v13 = vstv %s309_s1 }
 0x11f   :  { %s311_s6 = spop %310 }
 0x120   :  { %s313_s7 = spop %312  ;;  %v281_v16 = vstv %s311_s6 }
 0x121   :  { %v279_v11 = vstv %s313_s7  ;;  %s315_s8 = spop %314 }
 0x122   :  { %v277_v12 = vstv %s315_s8 }
 0x123   :  { %v278_v14 = vsel %vm276_vm8, %v277_v12, 0.0 }
 0x124   :  { %v280_v17 = vsel %vm275_vm9, %v279_v11, %v278_v14 }
 0x125   :  { %v282_v18 = vsel %vm274_vm10, %v281_v16, %v280_v17 }
 0x126   :  { %v284_v19 = vsel %vm273_vm11, %v283_v13, %v282_v18 }
 0x127   :  { %285 = vst [vmem:[#allocation8] sm:$0xff] %v284_v19 }
 0x128   :  { %385 = shalt.err (!%p382_p6)
}
 0x129   :  { %s386_s14 = scalar_lea.hbm %s523_s2, 128 }
 0x12a   :  { %p387_p7 = scmp.ne.s32.totalorder %s523_s2, %s386_s14  ;;  %p390_p8 = scmp.lt.u32.totalorder %s386_s14, %s523_s2 }
 0x12c   :  { %p392_p9 = pnand %p390_p8, %p387_p7 }
 0x12e   :  { %395 = shalt.err (!%p392_p9)
}
 0x12f   :  { %295 = dma.vmem_to_hbm [thread:$0]  %s293_s10, 128, %s523_s2, [#allocation5]  }
 0x130   :  { %400 = dma.done.wait [#allocation5], 128  }
 0x131   :  { %401 = vsyncadd [#allocation5], 4294967168 }
 0x132   :  { %299 = vsyncpa [#allocation4], 1 }
 0x133   :  { %300 = vsyncpa [#allocation7], 1 }
 0x134   :  { %301 = vsyncpa [#allocation5], 1 }

</bundles_post_ra>
